<compile_context>
chip_gen: v7x
topology: tpu7x:2x2x1
jax: 0.10.0
libtpu: 0.0.40
codegen_flags: <defaults>
</compile_context>

<pallas_src>
import math

import jax
import jax.numpy as jnp
from jax.experimental import pallas as pl
from jax.experimental.pallas import tpu as pltpu

LANE = 128
SUBLANE = 8


def _round_up(x, m):
    return (x + m - 1) // m * m


def _vmem_capacity_bytes():
    try:
        return int(pltpu.get_tpu_info().vmem_capacity_bytes)
    except Exception:
        return 64 * 1024 * 1024  # conservative: v7x per-core VMEM


def _make_encoder_kernel(B, Bp, Hp, table_in_vmem):
    """Fused multi-step GRU kernel (one grid step == one timestep)."""

    def kernel(idx_ref, gi_ref, h0_ref, whh_ref, bhn_ref, out_ref,
               h_scr, gi_buf, *dma_sems):
        # idx_ref : (T, Bp)    int32  SMEM (scalar prefetch) token ids
        # gi_ref  : (V, 3*Hp)  f32    VMEM (resident) or HBM (fallback) table
        # h0_ref  : (Bp, Hp)   f32    VMEM  initial hidden state
        # whh_ref : (Hp, 3*Hp) bf16   VMEM  W_hh^T (gate order r, z, n; padded)
        # bhn_ref : (1, Hp)    f32    VMEM  b_hn (only bias not folded)
        # out_ref : (1, Bp, Hp) f32   VMEM  per-step output block (== h_{t+1})
        # h_scr   : (Bp, Hp)   f32    VMEM scratch, carries h across steps
        # gi_buf  : (Bp, 3*Hp) f32    VMEM scratch, gathered rows for this step
        t = pl.program_id(0)

        @pl.when(t == 0)
        def _init():
            h_scr[...] = h0_ref[...]
            if (not table_in_vmem) and Bp > B:
                # padded rows are never DMA'd in the fallback path; zero once.
                gi_buf[...] = jnp.zeros_like(gi_buf)

        if table_in_vmem:
            # In-kernel gather from the VMEM-resident table (no DMAs / sems).
            # Padded batch rows use (clamped) token id 0.
            for b in range(Bp):
                gi_buf[pl.ds(b, 1), :] = gi_ref[pl.ds(idx_ref[t, b], 1), :]
            h = h_scr[...]
            gh = jnp.dot(h.astype(whh_ref.dtype), whh_ref[...],
                         preferred_element_type=jnp.float32)
        else:
            # Huge-vocab fallback: per-row HBM DMAs (real rows only),
            # overlapped with the recurrent matmul.
            sems = dma_sems[0]
            copies = [
                pltpu.make_async_copy(gi_ref.at[idx_ref[t, b]], gi_buf.at[b],
                                      sems.at[b])
                for b in range(B)
            ]
            for c in copies:
                c.start()
            h = h_scr[...]
            gh = jnp.dot(h.astype(whh_ref.dtype), whh_ref[...],
                         preferred_element_type=jnp.float32)
            for c in copies:
                c.wait()

        gi = gi_buf[...].astype(jnp.float32)

        # Gate math in f32; Hp is a multiple of 128 so every slice is a
        # lane-aligned static view.
        r = jax.nn.sigmoid(gi[:, 0 * Hp:1 * Hp] + gh[:, 0 * Hp:1 * Hp])
        z = jax.nn.sigmoid(gi[:, 1 * Hp:2 * Hp] + gh[:, 1 * Hp:2 * Hp])
        n = jnp.tanh(gi[:, 2 * Hp:3 * Hp]
                     + r * (gh[:, 2 * Hp:3 * Hp] + bhn_ref[...]))
        h_new = (1.0 - z) * n + z * h

        h_scr[...] = h_new          # carry to next timestep
        out_ref[0] = h_new          # lane-dense full-tile store

    return kernel


def prepare_encoder_params(params, weights_dtype=jnp.bfloat16):
    """Pre-fuse / pad parameters once (per model, not per step)."""
    emb, wihT, whhT, bih, bhh = params
    V, H = emb.shape
    Hp = _round_up(H, LANE)
    f32 = jnp.float32
    hi = jax.lax.Precision.HIGHEST

    gi_table = jnp.zeros((V, 3 * Hp), f32)
    whh_pad = jnp.zeros((Hp, 3 * Hp), f32)
    bhn_pad = jnp.zeros((1, Hp), f32)

    emb32 = emb.astype(f32)
    for g in range(3):
        w_ih_g = wihT[:, g * H:(g + 1) * H].astype(f32)
        w_hh_g = whhT[:, g * H:(g + 1) * H].astype(f32)
        b_ih_g = bih[0, g * H:(g + 1) * H].astype(f32)
        b_hh_g = bhh[0, g * H:(g + 1) * H].astype(f32)

        proj = jnp.dot(emb32, w_ih_g, precision=hi) + b_ih_g[None, :]
        if g < 2:  # r, z: b_hh folds straight into the gathered row
            proj = proj + b_hh_g[None, :]
        gi_table = gi_table.at[:, g * Hp:g * Hp + H].set(proj)
        whh_pad = whh_pad.at[:H, g * Hp:g * Hp + H].set(w_hh_g)

    bhn_pad = bhn_pad.at[0, :H].set(bhh[0, 2 * H:3 * H].astype(f32))

    # Recurrent weights in bf16 -> native MXU fast path with f32 accumulation.
    whh_pad = whh_pad.astype(weights_dtype)
    return dict(gi_table=gi_table, whh=whh_pad, bhn=bhn_pad, V=V, H=H, Hp=Hp)


def encoder_rnn_sequence(input_ids, hidden, kparams):
    """Run T GRU steps in a single fused pallas_call.

    input_ids : (T, B) int32, hidden : (1, B, H) f32
    returns   : (outputs (T, B, H), final hidden (1, B, H))
    """
    gi_table, whh, bhn = kparams["gi_table"], kparams["whh"], kparams["bhn"]
    V, H, Hp = kparams["V"], kparams["H"], kparams["Hp"]

    T, B = input_ids.shape
    Bp = _round_up(B, SUBLANE)

    # Pad / clamp once for the whole sequence (not per step).
    ids = jnp.clip(input_ids.astype(jnp.int32), 0, V - 1)   # guard OOB gathers
    ids_pad = jnp.zeros((T, Bp), jnp.int32).at[:, :B].set(ids)
    h0_pad = jnp.zeros((Bp, Hp), jnp.float32).at[:B, :H].set(
        hidden.reshape(B, H).astype(jnp.float32))

    # Generation-aware placement of the fused table (review: ~40 MiB usable on
    # v7x's 64 MiB vs ~80-100 MiB on v5e/v6e).  Pipelined inputs are
    # double-buffered, so budget 2x the resident arrays.
    itemsz = gi_table.dtype.itemsize
    table_bytes = gi_table.size * itemsz
    weight_bytes = whh.size * whh.dtype.itemsize + bhn.size * bhn.dtype.itemsize
    step_bytes = (3 * Bp * Hp * 4               # h scratch + out double-buffer
                  + Bp * 3 * Hp * itemsz        # gather buffer
                  + 2 * Bp * Hp * 4)            # h0 double buffer
    vmem_cap = _vmem_capacity_bytes()
    usable = (vmem_cap * 3) // 4
    table_in_vmem = 2 * table_bytes + 2 * weight_bytes + step_bytes <= usable

    if table_in_vmem:
        gi_spec = pl.BlockSpec((V, 3 * Hp), lambda t, ids_ref: (0, 0))
        scratch = [pltpu.VMEM((Bp, Hp), jnp.float32),
                   pltpu.VMEM((Bp, 3 * Hp), gi_table.dtype)]
    else:
        gi_spec = pl.BlockSpec(memory_space=pl.ANY)   # table stays in HBM
        scratch = [pltpu.VMEM((Bp, Hp), jnp.float32),
                   pltpu.VMEM((Bp, 3 * Hp), gi_table.dtype),
                   pltpu.SemaphoreType.DMA((Bp,))]

    resident = (2 * table_bytes if table_in_vmem else 0) \
        + 2 * weight_bytes + step_bytes
    vmem_limit = int(min(usable, max(32 * 2**20, resident + (4 << 20))))

    grid_spec = pltpu.PrefetchScalarGridSpec(
        num_scalar_prefetch=1,
        grid=(T,),
        in_specs=[
            gi_spec,
            pl.BlockSpec((Bp, Hp), lambda t, ids_ref: (0, 0)),       # h0
            pl.BlockSpec((Hp, 3 * Hp), lambda t, ids_ref: (0, 0)),   # W_hh^T
            pl.BlockSpec((1, Hp), lambda t, ids_ref: (0, 0)),        # b_hn
        ],
        out_specs=pl.BlockSpec((1, Bp, Hp), lambda t, ids_ref: (t, 0, 0)),
        scratch_shapes=scratch,
    )

    kernel = _make_encoder_kernel(B, Bp, Hp, table_in_vmem)
    out_pad = pl.pallas_call(
        kernel,
        out_shape=jax.ShapeDtypeStruct((T, Bp, Hp), jnp.float32),
        grid_spec=grid_spec,
        compiler_params=pltpu.CompilerParams(
            dimension_semantics=("arbitrary",),   # sequence carry
            vmem_limit_bytes=vmem_limit),
    )(ids_pad, gi_table, h0_pad, whh, bhn)

    outputs = out_pad[:, :B, :H]
    new_hidden = outputs[-1].reshape(1, B, H)
    return outputs, new_hidden


def encoder_rnn_forward(input_idx, hidden, kparams):
    """Mirrors EncoderRNN.forward(input, hidden): one step over a batch.

    input_idx : (B,) int32 token ids, hidden : (1, B, H) f32
    returns   : (output (1, B, H), hidden (1, B, H))   (output == new hidden)
    """
    outputs, new_hidden = encoder_rnn_sequence(input_idx[None, :], hidden,
                                               kparams)
    return outputs, new_hidden


def init_params(key, vocab_size, hidden_size):
    """Deterministic parameter init matching the module's shapes."""
    k_emb, k_wih, k_whh, k_bih, k_bhh = jax.random.split(key, 5)
    bound = 1.0 / math.sqrt(hidden_size)

    emb = jax.random.normal(k_emb, (vocab_size, hidden_size), jnp.float32)
    emb = emb.at[0].set(0.0)  # padding_idx=0 row is zero

    # Stored already transposed: (H, 3H), gate order (r, z, n).
    wihT = jax.random.uniform(k_wih, (hidden_size, 3 * hidden_size),
                              jnp.float32, -bound, bound)
    whhT = jax.random.uniform(k_whh, (hidden_size, 3 * hidden_size),
                              jnp.float32, -bound, bound)
    bih = jax.random.uniform(k_bih, (1, 3 * hidden_size), jnp.float32,
                             -bound, bound)
    bhh = jax.random.uniform(k_bhh, (1, 3 * hidden_size), jnp.float32,
                             -bound, bound)
    return emb, wihT, whhT, bih, bhh


def reference_step(x_ids, h, params):
    """Plain-JAX single GRU step (PyTorch GRU semantics, f32 HIGHEST)."""
    emb, wihT, whhT, bih, bhh = params
    H = emb.shape[1]
    hi = jax.lax.Precision.HIGHEST
    x = emb[x_ids]
    gi = jnp.dot(x, wihT, precision=hi) + bih
    gh = jnp.dot(h, whhT, precision=hi) + bhh
    r = jax.nn.sigmoid(gi[:, :H] + gh[:, :H])
    z = jax.nn.sigmoid(gi[:, H:2 * H] + gh[:, H:2 * H])
    n = jnp.tanh(gi[:, 2 * H:] + r * gh[:, 2 * H:])
    return (1.0 - z) * n + z * h


def reference_sequence(ids_seq, hidden, params):
    H = params[0].shape[1]
    h = hidden.reshape(-1, H).astype(jnp.float32)
    outs = []
    for t in range(ids_seq.shape[0]):
        h = reference_step(ids_seq[t], h, params)
        outs.append(h)
    return jnp.stack(outs, axis=0), h.reshape(hidden.shape)


if __name__ == "__main__":
    VOCAB = 50      # input_size
    HIDDEN = 32     # config.hidden_size (padded to 128 lanes inside wrapper)
    BATCH = 8
    SEQ = 6

    key = jax.random.PRNGKey(0)
    k_params, k_idx, k_h, k_seq = jax.random.split(key, 4)

    params = init_params(k_params, VOCAB, HIDDEN)
    kparams = prepare_encoder_params(params)

    # ---- single step: exactly the module's forward(input, hidden) ----
    input_idx = jax.random.randint(k_idx, (BATCH,), 0, VOCAB, dtype=jnp.int32)
    input_idx = input_idx.at[0].set(0)          # exercise padding_idx=0
    hidden = jax.random.normal(k_h, (1, BATCH, HIDDEN), jnp.float32)

    output, new_hidden = encoder_rnn_forward(input_idx, hidden, kparams)
    output = jax.block_until_ready(output)
    new_hidden = jax.block_until_ready(new_hidden)

    ref_h = reference_step(input_idx, hidden.reshape(BATCH, HIDDEN), params)
    assert output.shape == (1, BATCH, HIDDEN)
    assert new_hidden.shape == (1, BATCH, HIDDEN)
    assert jnp.allclose(output.reshape(BATCH, HIDDEN), ref_h,
                        rtol=1e-2, atol=1e-2)
    assert jnp.allclose(new_hidden.reshape(BATCH, HIDDEN), ref_h,
                        rtol=1e-2, atol=1e-2)

    # ---- fused multi-step path: grid=(T,), resident weights, carried h ----
    seq_ids = jax.random.randint(k_seq, (SEQ, BATCH), 0, VOCAB, dtype=jnp.int32)
    outs, h_last = encoder_rnn_sequence(seq_ids, hidden, kparams)
    outs = jax.block_until_ready(outs)
    h_last = jax.block_until_ready(h_last)

    ref_outs, ref_last = reference_sequence(seq_ids, hidden, params)
    assert outs.shape == (SEQ, BATCH, HIDDEN)
    assert jnp.allclose(outs, ref_outs, rtol=2e-2, atol=2e-2)
    assert jnp.allclose(h_last, ref_last, rtol=2e-2, atol=2e-2)

    print("KERNEL_OK")
</pallas_src>

<mosaic_0001>
module attributes {stable_mosaic.version = 11 : i64} {
  func.func @kernel(%arg0: i32, %arg1: memref<1x8xi32, #tpu.memory_space<smem>>, %arg2: memref<50x384xf32, #tpu.memory_space<vmem>>, %arg3: memref<8x128xf32, #tpu.memory_space<vmem>>, %arg4: memref<128x384xbf16, #tpu.memory_space<vmem>>, %arg5: memref<1x128xf32, #tpu.memory_space<vmem>>, %arg6: memref<1x8x128xf32, #tpu.memory_space<vmem>>, %arg7: memref<8x128xf32, #tpu.memory_space<vmem>>, %arg8: memref<8x384xf32, #tpu.memory_space<vmem>>) attributes {dimension_semantics = [#tpu.dimension_semantics<arbitrary>], iteration_bounds = array<i64: 1>, scalar_prefetch = 1 : i64, scratch_operands = 2 : i64, tpu.core_type = #tpu.core_type<tc>, window_params = [{pipeline_mode = #tpu.pipeline_mode<synchronous>, transform_indices = @transform_0, window_bounds = array<i64: 50, 384>}, {pipeline_mode = #tpu.pipeline_mode<synchronous>, transform_indices = @transform_1, window_bounds = array<i64: 8, 128>}, {pipeline_mode = #tpu.pipeline_mode<synchronous>, transform_indices = @transform_2, window_bounds = array<i64: 128, 384>}, {pipeline_mode = #tpu.pipeline_mode<synchronous>, transform_indices = @transform_3, window_bounds = array<i64: 1, 128>}, {transform_indices = @transform_4, window_bounds = array<i64: 1, 8, 128>}]} {
    %c0_i32 = arith.constant 0 : i32
    %0 = arith.cmpi eq, %arg0, %c0_i32 : i32
    %1 = arith.extui %0 : i1 to i32
    %c0_i32_0 = arith.constant 0 : i32
    %2 = arith.cmpi ne, %1, %c0_i32_0 : i32
    scf.if %2 {
      %c0_41 = arith.constant 0 : index
      %c0_42 = arith.constant 0 : index
      %81 = vector.load %arg3[%c0_41, %c0_42] : memref<8x128xf32, #tpu.memory_space<vmem>>, vector<8x128xf32>
      %c0_43 = arith.constant 0 : index
      %c0_44 = arith.constant 0 : index
      %82 = vector.load %arg7[%c0_43, %c0_44] : memref<8x128xf32, #tpu.memory_space<vmem>>, vector<8x128xf32>
      tpu.vector_store %arg7[%c0_43, %c0_44], %81 {strides = array<i32>} : memref<8x128xf32, #tpu.memory_space<vmem>>, vector<8x128xf32>,
    } else {
    }
    %3 = arith.index_cast %arg0 : i32 to index
    %c0 = arith.constant 0 : index
    %4 = memref.load %arg1[%3, %c0] : memref<1x8xi32, #tpu.memory_space<smem>>
    %5 = arith.index_cast %4 : i32 to index
    %c0_1 = arith.constant 0 : index
    %6 = vector.load %arg2[%5, %c0_1] : memref<50x384xf32, #tpu.memory_space<vmem>>, vector<1x384xf32>
    %c0_2 = arith.constant 0 : index
    %c0_3 = arith.constant 0 : index
    %7 = vector.load %arg8[%c0_2, %c0_3] : memref<8x384xf32, #tpu.memory_space<vmem>>, vector<1x384xf32>
    tpu.vector_store %arg8[%c0_2, %c0_3], %6 {strides = array<i32>} : memref<8x384xf32, #tpu.memory_space<vmem>>, vector<1x384xf32>,
    %8 = arith.index_cast %arg0 : i32 to index
    %c1 = arith.constant 1 : index
    %9 = memref.load %arg1[%8, %c1] : memref<1x8xi32, #tpu.memory_space<smem>>
    %10 = arith.index_cast %9 : i32 to index
    %c0_4 = arith.constant 0 : index
    %11 = vector.load %arg2[%10, %c0_4] : memref<50x384xf32, #tpu.memory_space<vmem>>, vector<1x384xf32>
    %c1_5 = arith.constant 1 : index
    %c0_6 = arith.constant 0 : index
    %12 = vector.load %arg8[%c1_5, %c0_6] : memref<8x384xf32, #tpu.memory_space<vmem>>, vector<1x384xf32>
    tpu.vector_store %arg8[%c1_5, %c0_6], %11 {strides = array<i32>} : memref<8x384xf32, #tpu.memory_space<vmem>>, vector<1x384xf32>,
    %13 = arith.index_cast %arg0 : i32 to index
    %c2 = arith.constant 2 : index
    %14 = memref.load %arg1[%13, %c2] : memref<1x8xi32, #tpu.memory_space<smem>>
    %15 = arith.index_cast %14 : i32 to index
    %c0_7 = arith.constant 0 : index
    %16 = vector.load %arg2[%15, %c0_7] : memref<50x384xf32, #tpu.memory_space<vmem>>, vector<1x384xf32>
    %c2_8 = arith.constant 2 : index
    %c0_9 = arith.constant 0 : index
    %17 = vector.load %arg8[%c2_8, %c0_9] : memref<8x384xf32, #tpu.memory_space<vmem>>, vector<1x384xf32>
    tpu.vector_store %arg8[%c2_8, %c0_9], %16 {strides = array<i32>} : memref<8x384xf32, #tpu.memory_space<vmem>>, vector<1x384xf32>,
    %18 = arith.index_cast %arg0 : i32 to index
    %c3 = arith.constant 3 : index
    %19 = memref.load %arg1[%18, %c3] : memref<1x8xi32, #tpu.memory_space<smem>>
    %20 = arith.index_cast %19 : i32 to index
    %c0_10 = arith.constant 0 : index
    %21 = vector.load %arg2[%20, %c0_10] : memref<50x384xf32, #tpu.memory_space<vmem>>, vector<1x384xf32>
    %c3_11 = arith.constant 3 : index
    %c0_12 = arith.constant 0 : index
    %22 = vector.load %arg8[%c3_11, %c0_12] : memref<8x384xf32, #tpu.memory_space<vmem>>, vector<1x384xf32>
    tpu.vector_store %arg8[%c3_11, %c0_12], %21 {strides = array<i32>} : memref<8x384xf32, #tpu.memory_space<vmem>>, vector<1x384xf32>,
    %23 = arith.index_cast %arg0 : i32 to index
    %c4 = arith.constant 4 : index
    %24 = memref.load %arg1[%23, %c4] : memref<1x8xi32, #tpu.memory_space<smem>>
    %25 = arith.index_cast %24 : i32 to index
    %c0_13 = arith.constant 0 : index
    %26 = vector.load %arg2[%25, %c0_13] : memref<50x384xf32, #tpu.memory_space<vmem>>, vector<1x384xf32>
    %c4_14 = arith.constant 4 : index
    %c0_15 = arith.constant 0 : index
    %27 = vector.load %arg8[%c4_14, %c0_15] : memref<8x384xf32, #tpu.memory_space<vmem>>, vector<1x384xf32>
    tpu.vector_store %arg8[%c4_14, %c0_15], %26 {strides = array<i32>} : memref<8x384xf32, #tpu.memory_space<vmem>>, vector<1x384xf32>,
    %28 = arith.index_cast %arg0 : i32 to index
    %c5 = arith.constant 5 : index
    %29 = memref.load %arg1[%28, %c5] : memref<1x8xi32, #tpu.memory_space<smem>>
    %30 = arith.index_cast %29 : i32 to index
    %c0_16 = arith.constant 0 : index
    %31 = vector.load %arg2[%30, %c0_16] : memref<50x384xf32, #tpu.memory_space<vmem>>, vector<1x384xf32>
    %c5_17 = arith.constant 5 : index
    %c0_18 = arith.constant 0 : index
    %32 = vector.load %arg8[%c5_17, %c0_18] : memref<8x384xf32, #tpu.memory_space<vmem>>, vector<1x384xf32>
    tpu.vector_store %arg8[%c5_17, %c0_18], %31 {strides = array<i32>} : memref<8x384xf32, #tpu.memory_space<vmem>>, vector<1x384xf32>,
    %33 = arith.index_cast %arg0 : i32 to index
    %c6 = arith.constant 6 : index
    %34 = memref.load %arg1[%33, %c6] : memref<1x8xi32, #tpu.memory_space<smem>>
    %35 = arith.index_cast %34 : i32 to index
    %c0_19 = arith.constant 0 : index
    %36 = vector.load %arg2[%35, %c0_19] : memref<50x384xf32, #tpu.memory_space<vmem>>, vector<1x384xf32>
    %c6_20 = arith.constant 6 : index
    %c0_21 = arith.constant 0 : index
    %37 = vector.load %arg8[%c6_20, %c0_21] : memref<8x384xf32, #tpu.memory_space<vmem>>, vector<1x384xf32>
    tpu.vector_store %arg8[%c6_20, %c0_21], %36 {strides = array<i32>} : memref<8x384xf32, #tpu.memory_space<vmem>>, vector<1x384xf32>,
    %38 = arith.index_cast %arg0 : i32 to index
    %c7 = arith.constant 7 : index
    %39 = memref.load %arg1[%38, %c7] : memref<1x8xi32, #tpu.memory_space<smem>>
    %40 = arith.index_cast %39 : i32 to index
    %c0_22 = arith.constant 0 : index
    %41 = vector.load %arg2[%40, %c0_22] : memref<50x384xf32, #tpu.memory_space<vmem>>, vector<1x384xf32>
    %c7_23 = arith.constant 7 : index
    %c0_24 = arith.constant 0 : index
    %42 = vector.load %arg8[%c7_23, %c0_24] : memref<8x384xf32, #tpu.memory_space<vmem>>, vector<1x384xf32>
    tpu.vector_store %arg8[%c7_23, %c0_24], %41 {strides = array<i32>} : memref<8x384xf32, #tpu.memory_space<vmem>>, vector<1x384xf32>,
    %c0_25 = arith.constant 0 : index
    %c0_26 = arith.constant 0 : index
    %43 = vector.load %arg7[%c0_25, %c0_26] : memref<8x128xf32, #tpu.memory_space<vmem>>, vector<8x128xf32>
    %44 = arith.truncf %43 : vector<8x128xf32> to vector<8x128xbf16>
    %c0_27 = arith.constant 0 : index
    %c0_28 = arith.constant 0 : index
    %45 = vector.load %arg4[%c0_27, %c0_28] : memref<128x384xbf16, #tpu.memory_space<vmem>>, vector<128x384xbf16>
    %cst = arith.constant dense<0.000000e+00> : vector<8x384xf32>
    %46 = tpu.matmul %44, %45, %cst {dimension_numbers = #tpu.dot_dimension_numbers<[1], [0], [0], [1], [0, 0, 1, 1], [], []>} : vector<8x128xbf16>, vector<128x384xbf16>, vector<8x384xf32> -> vector<8x384xf32>
    %c0_29 = arith.constant 0 : index
    %c0_30 = arith.constant 0 : index
    %47 = vector.load %arg8[%c0_29, %c0_30] : memref<8x384xf32, #tpu.memory_space<vmem>>, vector<8x384xf32>
    %48 = vector.extract_strided_slice %47 {offsets = [0, 0], sizes = [8, 128], strides = [1, 1]} : vector<8x384xf32> to vector<8x128xf32>
    %49 = vector.extract_strided_slice %46 {offsets = [0, 0], sizes = [8, 128], strides = [1, 1]} : vector<8x384xf32> to vector<8x128xf32>
    %50 = arith.addf %48, %49 : vector<8x128xf32>
    %51 = arith.negf %50 : vector<8x128xf32>
    %52 = math.exp %51 : vector<8x128xf32>
    %cst_31 = arith.constant 1.000000e+00 : f32
    %53 = vector.broadcast %cst_31 : f32 to vector<8x128xf32>
    %54 = arith.addf %53, %52 : vector<8x128xf32>
    %55 = arith.divf %53, %54 : vector<8x128xf32>
    %56 = vector.extract_strided_slice %47 {offsets = [0, 128], sizes = [8, 128], strides = [1, 1]} : vector<8x384xf32> to vector<8x128xf32>
    %57 = vector.extract_strided_slice %46 {offsets = [0, 128], sizes = [8, 128], strides = [1, 1]} : vector<8x384xf32> to vector<8x128xf32>
    %58 = arith.addf %56, %57 : vector<8x128xf32>
    %59 = arith.negf %58 : vector<8x128xf32>
    %60 = math.exp %59 : vector<8x128xf32>
    %cst_32 = arith.constant 1.000000e+00 : f32
    %61 = vector.broadcast %cst_32 : f32 to vector<8x128xf32>
    %62 = arith.addf %61, %60 : vector<8x128xf32>
    %63 = arith.divf %61, %62 : vector<8x128xf32>
    %64 = vector.extract_strided_slice %47 {offsets = [0, 256], sizes = [8, 128], strides = [1, 1]} : vector<8x384xf32> to vector<8x128xf32>
    %65 = vector.extract_strided_slice %46 {offsets = [0, 256], sizes = [8, 128], strides = [1, 1]} : vector<8x384xf32> to vector<8x128xf32>
    %c0_33 = arith.constant 0 : index
    %c0_34 = arith.constant 0 : index
    %66 = vector.load %arg5[%c0_33, %c0_34] : memref<1x128xf32, #tpu.memory_space<vmem>>, vector<1x128xf32>
    %67 = vector.broadcast %66 : vector<1x128xf32> to vector<8x128xf32>
    %68 = arith.addf %65, %67 : vector<8x128xf32>
    %69 = arith.mulf %55, %68 : vector<8x128xf32>
    %70 = arith.addf %64, %69 : vector<8x128xf32>
    %71 = math.tanh %70 : vector<8x128xf32>
    %cst_35 = arith.constant 1.000000e+00 : f32
    %72 = vector.broadcast %cst_35 : f32 to vector<8x128xf32>
    %73 = arith.subf %72, %63 : vector<8x128xf32>
    %74 = arith.mulf %73, %71 : vector<8x128xf32>
    %75 = arith.mulf %63, %43 : vector<8x128xf32>
    %76 = arith.addf %74, %75 : vector<8x128xf32>
    %c0_36 = arith.constant 0 : index
    %c0_37 = arith.constant 0 : index
    %77 = vector.load %arg7[%c0_36, %c0_37] : memref<8x128xf32, #tpu.memory_space<vmem>>, vector<8x128xf32>
    tpu.vector_store %arg7[%c0_36, %c0_37], %76 {strides = array<i32>} : memref<8x128xf32, #tpu.memory_space<vmem>>, vector<8x128xf32>,
    %c0_38 = arith.constant 0 : index
    %c0_39 = arith.constant 0 : index
    %c0_40 = arith.constant 0 : index
    %78 = vector.load %arg6[%c0_38, %c0_39, %c0_40] : memref<1x8x128xf32, #tpu.memory_space<vmem>>, vector<1x8x128xf32>
    %79 = vector.shape_cast %78 : vector<1x8x128xf32> to vector<8x128xf32>
    %80 = vector.shape_cast %76 : vector<8x128xf32> to vector<1x8x128xf32>
    tpu.vector_store %arg6[%c0_38, %c0_39, %c0_40], %80 {strides = array<i32>} : memref<1x8x128xf32, #tpu.memory_space<vmem>>, vector<1x8x128xf32>,
    return
  }
  func.func @transform_0(%arg0: i32, %arg1: memref<1x8xi32, #tpu.memory_space<smem>>) -> (i32, i32) {
    %c0_i32 = arith.constant 0 : i32
    %c0_i32_0 = arith.constant 0 : i32
    %c0_i32_1 = arith.constant 0 : i32
    return %c0_i32, %c0_i32_0 : i32, i32
  }
  func.func @transform_1(%arg0: i32, %arg1: memref<1x8xi32, #tpu.memory_space<smem>>) -> (i32, i32) {
    %c0_i32 = arith.constant 0 : i32
    %c0_i32_0 = arith.constant 0 : i32
    %c0_i32_1 = arith.constant 0 : i32
    return %c0_i32, %c0_i32_0 : i32, i32
  }
  func.func @transform_2(%arg0: i32, %arg1: memref<1x8xi32, #tpu.memory_space<smem>>) -> (i32, i32) {
    %c0_i32 = arith.constant 0 : i32
    %c0_i32_0 = arith.constant 0 : i32
    %c0_i32_1 = arith.constant 0 : i32
    return %c0_i32, %c0_i32_0 : i32, i32
  }
  func.func @transform_3(%arg0: i32, %arg1: memref<1x8xi32, #tpu.memory_space<smem>>) -> (i32, i32) {
    %c0_i32 = arith.constant 0 : i32
    %c0_i32_0 = arith.constant 0 : i32
    %c0_i32_1 = arith.constant 0 : i32
    return %c0_i32, %c0_i32_0 : i32, i32
  }
  func.func @transform_4(%arg0: i32, %arg1: memref<1x8xi32, #tpu.memory_space<smem>>) -> (i32, i32, i32) {
    %c0_i32 = arith.constant 0 : i32
    %c0_i32_0 = arith.constant 0 : i32
    %c0_i32_1 = arith.constant 0 : i32
    return %arg0, %c0_i32, %c0_i32_0 : i32, i32, i32
  }
}

</mosaic_0001>

<bundles_post_ra>
// kernel: tpu_custom_call.1
= control target key start
LH: loop header
LB: loop body
LE: loop exit
PB: predicated region body
PF: predicated region fallthrough
CT: control target
= control target key end

     0   :  { %s905_s0 = inlined_call_operand.hbm [shape: s32[1,8], index: 0, kind: input, shape index: {}]   ;;  %s906_s1 = inlined_call_operand.hbm [shape: f32[50,384], index: 1, kind: input, shape index: {}]   ;;  %s907_s2 = inlined_call_operand.hbm [shape: f32[8,128], index: 2, kind: input, shape index: {}]   ;;  %s908_s3 = inlined_call_operand.hbm [shape: bf16[128,384], index: 3, kind: input, shape index: {}]   ;;  %s909_s4 = inlined_call_operand.vmem [shape: f32[1,128], index: 4, kind: input, shape index: {}]   ;;  %s910_s5 = inlined_call_operand.hbm [shape: f32[1,8,128], index: 5, kind: output, shape index: {}]  }
   0x1   :  { %s626_s20 = scalar_lea.hbm %s905_s0, 16 }
   0x2   :  { %p627_p0 = scmp.ne.s32.totalorder %s905_s0, %s626_s20  ;;  %p630_p1 = scmp.lt.u32.totalorder %s626_s20, %s905_s0 }
   0x4   :  { %p632_p2 = pnand %p630_p1, %p627_p0 }
   0x6   :  { %635 = shalt.err (!%p632_p2)  }
   0x7   :  { %s732_s25 = smov [#allocation5]  }
   0x8   :  { %11 = dma.hbm_to_smem %s905_s0, 16, %s732_s25, [#allocation4] }
   0x9   :  { %724 = dma.done.wait [#allocation4], 16 }
   0xa   :  { %725 = vsyncadd [#allocation4], 4294967280 }
   0xb   :  { %13 = sfence }
   0xc   :  { %14 = vsyncpa [#allocation7], 0 }
   0xd   :  { %15 = vsyncpa [#allocation10], 0 }
   0xe   :  { %16 = vsyncpa [#allocation8], 0  ;;  %s733_s28 = smov [#allocation9]   ;;  %s734_s30 = smov [#allocation6]  }
   0xf   :  { %s35_s29 = sshll.u32 %s733_s28, 4  ;;  %s22_s6 = sshll.u32 %s734_s30, 4  ;;  %s36_s29 = int_to_ptr.vmem [resolvable:$true] %s35_s29  ;;  %s786_s6 = int_to_ptr.vmem [resolvable:$true] %s22_s6 }
  0x10   :  { %s636_s9 = scalar_lea.hbm %s907_s2, 128 }
  0x11   :  { %p637_p3 = scmp.ne.s32.totalorder %s907_s2, %s636_s9  ;;  %p640_p4 = scmp.lt.u32.totalorder %s636_s9, %s907_s2 }
  0x13   :  { %p642_p5 = pnand %p640_p4, %p637_p3 }
  0x15   :  { %645 = shalt.err (!%p642_p5)
}
  0x16   :  { %s646_s13 = scalar_lea.vmem %s36_s29, 128  ;;  %p651_p7 = scmp.lt.s32.totalorder %s36_s29, %s36_s29 }
  0x17   :  { %p647_p6 = scmp.ne.s32.totalorder %s36_s29, %s646_s13  ;;  %p652_p8 = scmp.lt.s32.totalorder %s646_s13, %s646_s13 }
  0x19   :  { %p653_p9 = por %p652_p8, %p651_p7 }
  0x1b   :  { %p654_p10 = pnand %p653_p9, %p647_p6 }
  0x1d   :  { %657 = shalt.err (!%p654_p10)
}
  0x1e   :  { %38 = dma.hbm_to_vmem [thread:$0]  %s907_s2, 128, %s36_s29, [#allocation10]  }
  0x1f   :  { %s658_s18 = scalar_lea.hbm %s906_s1, 2688 }
  0x20   :  { %p659_p11 = scmp.ne.s32.totalorder %s906_s1, %s658_s18  ;;  %p662_p12 = scmp.lt.u32.totalorder %s658_s18, %s906_s1 }
  0x22   :  { %p664_p13 = pnand %p662_p12, %p659_p11 }
  0x24   :  { %667 = shalt.err (!%p664_p13)
}
  0x25   :  { %s668_s23 = scalar_lea.vmem %s786_s6, 2688  ;;  %p673_p1 = scmp.lt.s32.totalorder %s786_s6, %s786_s6 }
  0x26   :  { %p669_p0 = scmp.ne.s32.totalorder %s786_s6, %s668_s23  ;;  %p674_p2 = scmp.lt.s32.totalorder %s668_s23, %s668_s23 }
  0x28   :  { %p675_p3 = por %p674_p2, %p673_p1 }
  0x2a   :  { %p676_p4 = pnand %p675_p3, %p669_p0 }
  0x2c   :  { %679 = shalt.err (!%p676_p4)
}
  0x2d   :  { %s735_s2 = smov 384   ;;  %s736_s24 = smov 24  }
  0x2e   :  { %28 = dma.hbm_to_vmem [thread:$0]  %s906_s1, 2688, %s786_s6, [#allocation7], %s735_s2, %s735_s2, %s736_s24  }
  0x2f   :  { %s737_s27 = smov [#allocation11]   ;;  %s680_s7 = scalar_lea.hbm %s908_s3, 3072 }
  0x30   :  { %s44_s28 = sshll.u32 %s737_s27, 4  ;;  %p681_p5 = scmp.ne.s32.totalorder %s908_s3, %s680_s7  ;;  %s45_s28 = int_to_ptr.vmem [resolvable:$true] %s44_s28 }
  0x31   :  { %p684_p6 = scmp.lt.u32.totalorder %s680_s7, %s908_s3 }
  0x33   :  { %p686_p7 = pnand %p684_p6, %p681_p5 }
  0x35   :  { %689 = shalt.err (!%p686_p7)
}
  0x36   :  { %s690_s0 = scalar_lea.vmem %s45_s28, 3072  ;;  %p695_p9 = scmp.lt.s32.totalorder %s45_s28, %s45_s28 }
  0x37   :  { %p691_p8 = scmp.ne.s32.totalorder %s45_s28, %s690_s0  ;;  %p696_p10 = scmp.lt.s32.totalorder %s690_s0, %s690_s0 }
  0x39   :  { %p697_p11 = por %p696_p10, %p695_p9 }
  0x3b   :  { %p698_p12 = pnand %p697_p11, %p691_p8 }
  0x3d   :  { %701 = shalt.err (!%p698_p12)
}
  0x3e   :  { %s738_s1 = smov 192   ;;  %s739_s6 = smov 12  }
  0x3f   :  { %50 = dma.hbm_to_vmem [thread:$0]  %s908_s3, 3072, %s45_s28, [#allocation10], %s738_s1, %s738_s1, %s739_s6  }
  0x40   :  { %726 = dma.done.wait [#allocation7], 2688  }
  0x41   :  { %727 = vsyncadd [#allocation7], 4294964608 }
  0x42   :  { %728 = dma.done.wait [#allocation10], 3200  }
  0x43   :  { %729 = vsyncadd [#allocation10], 4294964096  ;;  %v740_v0 = vmov 0.0   ;;  %v741_v1 = vmov 0   ;;  %vm742_vm0 = vmmov 0   ;;  %s831_s14 = sld [smem:[#allocation5]]  ;;  %v80_v14 = vlaneseq }
  0x44   :  { %552 = vmatprep.subr.bf16.mxu1 %v740_v0  ;;  %378 = vmatprep.mubr.bf16.mxu0 %v741_v1  ;;  %s833_s15 = sld [smem:[#allocation5 + $0x1]]  ;;  %s835_s16 = sld [smem:[#allocation5 + $0x2]]  ;;  %v584_v2 = vld [vmem:[#allocation11 + $0x4] ss:$12 sps:$4 sm:$0xff]   ;;  %v586_v3 = vld [vmem:[#allocation11] ss:$12 sps:$4 sm:$0xff]  }
  0x45   :  { %568 = vmatprep.mubr.msk.bf16.mxu1 %vm742_vm0, %v740_v0  ;;  %346 = vmatprep.subr.bf16.mxu0 %v584_v2  ;;  %v587_v4 = vld [vmem:[#allocation11 + $0x1c] ss:$12 sps:$4 sm:$0xff]   ;;  %s837_s3 = sld [smem:[#allocation5 + $0x3]]  ;;  %v589_v5 = vld [vmem:[#allocation11 + $0x18] ss:$12 sps:$4 sm:$0xff]   ;;  %s840_s18 = sld [smem:[#allocation5 + $0x4]] }
  0x46   :  { %347 = vmatpush1.bf16.msra.mxu0 %v586_v3  ;;  %v590_v6 = vld [vmem:[#allocation11 + $0x34] ss:$12 sps:$4 sm:$0xff]   ;;  %s844_s21 = sld [smem:[#allocation5 + $0x5]]  ;;  %s846_s23 = sld [smem:[#allocation5 + $0x6]]  ;;  %v592_v7 = vld [vmem:[#allocation11 + $0x30] ss:$12 sps:$4 sm:$0xff]  }
  0x47   :  { %348 = vmatprep.subr.bf16.mxu0 %v587_v4  ;;  %v593_v8 = vld [vmem:[#allocation11 + $0x4c] ss:$12 sps:$4 sm:$0xff]   ;;  %v604_v9 = vld [vmem:[#allocation11 + $0x8] ss:$12 sps:$4 sm:$0xff]   ;;  %v596_v11 = vld [vmem:[#allocation11 + $0x64] ss:$12 sps:$4 sm:$0xff]  }
  0x48   :  { %v595_v10 = vld [vmem:[#allocation11 + $0x48] ss:$12 sps:$4 sm:$0xff]   ;;  %553 = vmatpush3.bf16.msra.mxu1 %v604_v9  ;;  %v608_v12 = vld [vmem:[#allocation11 + $0x20] ss:$12 sps:$4 sm:$0xff]   ;;  %s853_s7 = sld [smem:[#allocation5 + $0x7]]  ;;  %vm857_vm1 = vcmp.lt.s32.totalorder %v80_v14, 384 }
  0x49   :  { %s71_s17 = sshra.s32 %s831_s14, 3  ;;  %s74_s2 = sand.u32 7, %s831_s14  ;;  %554 = vmatprep.subr.bf16.mxu1 %v740_v0  ;;  %v598_v13 = vld [vmem:[#allocation11 + $0x60] ss:$12 sps:$4 sm:$0xff]   ;;  %v599_v15 = vld [vmem:[#allocation11 + $0x7c] ss:$12 sps:$4 sm:$0xff]  }
  0x4a   :  { %s88_s19 = sshra.s32 %s833_s15, 3  ;;  %s102_s20 = sshra.s32 %s835_s16, 3  ;;  %349 = vmatpush1.bf16.msra.mxu0 %v589_v5  ;;  %v610_v16 = vld [vmem:[#allocation11 + $0x38] ss:$12 sps:$4 sm:$0xff]   ;;  %v602_v19 = vld [vmem:[#allocation11 + $0x94] ss:$12 sps:$4 sm:$0xff]  }
  0x4b   :  { %s501_s22 = smul.u32 24, %s71_s17  ;;  %350 = vmatprep.subr.bf16.mxu0 %v590_v6  ;;  %s91_s25 = sand.u32 7, %s833_s15  ;;  %v601_v17 = vld [vmem:[#allocation11 + $0x78] ss:$12 sps:$4 sm:$0xff]   ;;  %v611_v20 = vld [vmem:[#allocation11 + $0x50] ss:$12 sps:$4 sm:$0xff]  }
  0x4c   :  { %s503_s24 = smul.u32 24, %s88_s19  ;;  %s105_s27 = sand.u32 7, %s835_s16  ;;  %555 = vmatpush3.bf16.msra.mxu1 %v608_v12  ;;  %v605_v25 = vld [vmem:[#allocation11 + $0x90] ss:$12 sps:$4 sm:$0xff]   ;;  %v612_v26 = vld [vmem:[#allocation11 + $0x68] ss:$12 sps:$4 sm:$0xff]  }
  0x4d   :  { %s505_s26 = smul.u32 24, %s102_s20  ;;  %s116_s28 = sshra.s32 %s837_s3, 3  ;;  %556 = vmatprep.subr.bf16.mxu1 %v740_v0  ;;  %v606_v27 = vld [vmem:[#allocation11 + $0xac] ss:$12 sps:$4 sm:$0xff]   ;;  %v609_v28 = vld [vmem:[#allocation11 + $0xa8] ss:$12 sps:$4 sm:$0xff]  }
  0x4e   :  { %351 = vmatpush1.bf16.msra.mxu0 %v592_v7  ;;  %s77_s29 = sadd.s32 %s501_s22, %s74_s2  ;;  %s94_s30 = sadd.s32 %s503_s24, %s91_s25  ;;  %v67_v31 = vld [vmem:[#allocation9] sm:$0xff]  ;;  %v613_v32 = vld [vmem:[#allocation11 + $0x80] ss:$12 sps:$4 sm:$0xff]  }
  0x4f   :  { %352 = vmatprep.subr.bf16.mxu0 %v593_v8  ;;  %s108_s8 = sadd.s32 %s505_s26, %s105_s27  ;;  %s507_s9 = smul.u32 24, %s116_s28  ;;  %v185_v33 = vpack.c.bf16 %v67_v31, %v67_v31  ;;  %v614_v35 = vld [vmem:[#allocation11 + $0x98] ss:$12 sps:$4 sm:$0xff]   ;;  %v615_v37 = vld [vmem:[#allocation11 + $0xb0] ss:$12 sps:$4 sm:$0xff]  }
  0x50   :  { %s119_s10 = sand.u32 7, %s837_s3  ;;  %s130_s0 = sshra.s32 %s840_s18, 3  ;;  %557 = vmatpush3.bf16.msra.mxu1 %v610_v16  ;;  %v542_v55 = vld [vmem:[%s909_s4] ss:$0 sm:$0xff] }
  0x51   :  { %s122_s11 = sadd.s32 %s507_s9, %s119_s10  ;;  %s78_s1 = scalar_lea.vmem [#allocation6], %s77_s29  ;;  %558 = vmatprep.subr.bf16.mxu1 %v740_v0 }
  0x52   :  { %353 = vmatpush1.bf16.msra.mxu0 %v595_v10  ;;  %v79_v21 = vld [vmem:[%s78_s1] ss:$8 sm:$0x7]  ;;  %s95_s6 = scalar_lea.vmem [#allocation6], %s94_s30  ;;  %s109_s12 = scalar_lea.vmem [#allocation6], %s108_s8 }
  0x53   :  { %354 = vmatprep.subr.bf16.mxu0 %v596_v11  ;;  %v96_v22 = vld [vmem:[%s95_s6] ss:$8 sm:$0x7]  ;;  %84 = vst.msk [vmem:[#allocation3] ss:$8 sm:$0x7] %vm857_vm1, %v79_v21 }
  0x54   :  { %98 = vst.msk [vmem:[#allocation3 + $0x1] ss:$8 sm:$0x7] %vm857_vm1, %v96_v22  ;;  %v110_v23 = vld [vmem:[%s109_s12] ss:$8 sm:$0x7]  ;;  %559 = vmatpush3.bf16.msra.mxu1 %v611_v20 }
  0x55   :  { %s133_s13 = sand.u32 7, %s840_s18  ;;  %112 = vst.msk [vmem:[#allocation3 + $0x2] ss:$8 sm:$0x7] %vm857_vm1, %v110_v23  ;;  %s123_s14 = scalar_lea.vmem [#allocation6], %s122_s11  ;;  %560 = vmatprep.subr.bf16.mxu1 %v740_v0 }
  0x56   :  { %355 = vmatpush1.bf16.msra.mxu0 %v598_v13  ;;  %v124_v24 = vld [vmem:[%s123_s14] ss:$8 sm:$0x7]  ;;  %s509_s15 = smul.u32 24, %s130_s0  ;;  %s144_s16 = sshra.s32 %s844_s21, 3 }
  0x57   :  { %356 = vmatprep.subr.bf16.mxu0 %v599_v15  ;;  %126 = vst.msk [vmem:[#allocation3 + $0x3] ss:$8 sm:$0x7] %vm857_vm1, %v124_v24  ;;  %s147_s3 = sand.u32 7, %s844_s21  ;;  %s511_s17 = smul.u32 24, %s144_s16 }
  0x58   :  { %s136_s19 = sadd.s32 %s509_s15, %s133_s13  ;;  %s158_s18 = sshra.s32 %s846_s23, 3  ;;  %561 = vmatpush3.bf16.msra.mxu1 %v612_v26 }
  0x59   :  { %s150_s20 = sadd.s32 %s511_s17, %s147_s3  ;;  %s137_s22 = scalar_lea.vmem [#allocation6], %s136_s19  ;;  %562 = vmatprep.subr.bf16.mxu1 %v740_v0 }
  0x5a   :  { %357 = vmatpush1.bf16.msra.mxu0 %v601_v17  ;;  %v138_v29 = vld [vmem:[%s137_s22] ss:$8 sm:$0x7]  ;;  %s161_s2 = sand.u32 7, %s846_s23  ;;  %s151_s21 = scalar_lea.vmem [#allocation6], %s150_s20 }
  0x5b   :  { %358 = vmatprep.subr.bf16.mxu0 %v602_v19  ;;  %140 = vst.msk [vmem:[#allocation3 + $0x4] ss:$8 sm:$0x7] %vm857_vm1, %v138_v29  ;;  %v152_v30 = vld [vmem:[%s151_s21] ss:$8 sm:$0x7] }
  0x5c   :  { %s513_s24 = smul.u32 24, %s158_s18  ;;  %s172_s25 = sshra.s32 %s853_s7, 3  ;;  %154 = vst.msk [vmem:[#allocation3 + $0x5] ss:$8 sm:$0x7] %vm857_vm1, %v152_v30  ;;  %563 = vmatpush3.bf16.msra.mxu1 %v613_v32 }
  0x5d   :  { %s175_s26 = sand.u32 7, %s853_s7  ;;  %s515_s27 = smul.u32 24, %s172_s25  ;;  %564 = vmatprep.subr.bf16.mxu1 %v740_v0 }
  0x5e   :  { %359 = vmatpush1.bf16.msra.mxu0 %v605_v25  ;;  %s164_s23 = sadd.s32 %s513_s24, %s161_s2  ;;  %s743_s9 = smov [#allocation12]  }
  0x5f   :  { %360 = vmatprep.subr.bf16.mxu0 %v606_v27  ;;  %s178_s28 = sadd.s32 %s515_s27, %s175_s26  ;;  %s165_s29 = scalar_lea.vmem [#allocation6], %s164_s23 }
  0x60   :  { %v166_v34 = vld [vmem:[%s165_s29] ss:$8 sm:$0x7]  ;;  %s179_s30 = scalar_lea.vmem [#allocation6], %s178_s28  ;;  %565 = vmatpush3.bf16.msra.mxu1 %v614_v35  ;;  %s467_s10 = sshll.u32 %s743_s9, 4  ;;  %s468_s10 = int_to_ptr.vmem [resolvable:$true] %s467_s10 }
  0x61   :  { %168 = vst.msk [vmem:[#allocation3 + $0x6] ss:$8 sm:$0x7] %vm857_vm1, %v166_v34  ;;  %v180_v36 = vld [vmem:[%s179_s30] ss:$8 sm:$0x7]  ;;  %566 = vmatprep.subr.bf16.mxu1 %v740_v0  ;;  %p707_p0 = scmp.lt.s32.totalorder %s468_s10, %s468_s10 }
  0x62   :  { %361 = vmatpush1.bf16.msra.mxu0 %v609_v28  ;;  %182 = vst.msk [vmem:[#allocation3 + $0x7] ss:$8 sm:$0x7] %vm857_vm1, %v180_v36  ;;  %s702_s11 = scalar_lea.vmem %s468_s10, 128 }
  0x63   :  { %p703_p13 = scmp.ne.s32.totalorder %s468_s10, %s702_s11  ;;  %p708_p1 = scmp.lt.s32.totalorder %s702_s11, %s702_s11 }
  0x64   :  { %567 = vmatpush3.bf16.msra.mxu1 %v615_v37 }
  0x65   :  { %379 = vmatmul.mubr.bf16.vlgmr.msra.gmra.mrb[0].mxu0 %v185_v33  ;;  %p709_p2 = por %p708_p1, %p707_p0 }
  0x67   :  { %569 = vmatmul.mubr.bf16.vlgmr.msra.gmra.mrb[0].mxu1 %v185_v33  ;;  %p710_p3 = pnand %p709_p2, %p703_p13 }
  0x69   :  { %v427_v38 = vld [vmem:[#allocation3] sm:$0xff]  ;;  %v428_v42 = vld [vmem:[#allocation3 + $0x8] sm:$0xff]  ;;  %v429_v59 = vld [vmem:[#allocation3 + $0x10] sm:$0xff] }
 0x138   :  { %v380_v39 = vpop.f32.mrb[0].mxu0 }
 0x139   :  { %v430_v40 = vadd.f32 %v427_v38, %v380_v39  ;;  %v382_v41 = vpop.f32.mrb[1].mxu0 }
 0x13a   :  { %v384_v43 = vpop.f32.mrb[2].mxu0  ;;  %v437_v46 = vadd.f32 %v428_v42, %v382_v41  ;;  %v421_v48 = vpop.f32.mrb[0].mxu1 }
 0x13b   :  { %v540_v44 = vmul.f32 -1.442695, %v430_v40  ;;  %v385_v45 = vpop.f32.mrb[3].mxu0  ;;  %v570_v49 = vpop.f32.mrb[1].mxu1  ;;  %v451_v57 = vadd.f32 %v542_v55, %v421_v48 }
 0x13c   :  { %v541_v47 = vmul.f32 -1.442695, %v437_v46  ;;  %v424_v50 = vpop.f32.mrb[2].mxu1 }
 0x13d   :  { %616 = vpow2.f32 %v540_v44  ;;  %v571_v51 = vpop.f32.mrb[3].mxu1 }
 0x13e   :  { %618 = vpow2.f32 %v541_v47 }
 0x147   :  { %v617_v52 = vpop.eup %616 }
 0x148   :  { %v434_v53 = vadd.f32 1.0, %v617_v52  ;;  %v619_v54 = vpop.eup %618 }
 0x149   :  { %v441_v56 = vadd.f32 1.0, %v619_v54 }
 0x14a   :  { %620 = vrcp.f32 %v434_v53 }
 0x14b   :  { %622 = vrcp.f32 %v441_v56 }
 0x154   :  { %v621_v58 = vpop.eup %620 }
 0x155   :  { %v452_v60 = vmul.f32 %v621_v58, %v451_v57  ;;  %v623_v62 = vpop.eup %622 }
 0x156   :  { %v455_v63 = vsub.f32 1.0, %v623_v62  ;;  %v457_v2 = vmul.f32 %v623_v62, %v67_v31 }
 0x157   :  { %v453_v61 = vadd.f32 %v452_v60, %v429_v59 }
 0x159   :  { %624 = vtanh.f32 %v453_v61 }
 0x163   :  { %v625_v0 = vpop.eup %624 }
 0x164   :  { %v456_v1 = vmul.f32 %v625_v0, %v455_v63 }
 0x166   :  { %v458_v3 = vadd.f32 %v457_v2, %v456_v1 }
 0x168   :  { %460 = vst [vmem:[#allocation12] sm:$0xff] %v458_v3 }
 0x169   :  { %713 = shalt.err (!%p710_p3)
}
 0x16a   :  { %s714_s1 = scalar_lea.hbm %s910_s5, 128 }
 0x16b   :  { %p715_p4 = scmp.ne.s32.totalorder %s910_s5, %s714_s1  ;;  %p718_p5 = scmp.lt.u32.totalorder %s714_s1, %s910_s5 }
 0x16d   :  { %p720_p6 = pnand %p718_p5, %p715_p4 }
 0x16f   :  { %723 = shalt.err (!%p720_p6)
}
 0x170   :  { %470 = dma.vmem_to_hbm [thread:$0]  %s468_s10, 128, %s910_s5, [#allocation8]  }
 0x171   :  { %730 = dma.done.wait [#allocation8], 128  }
 0x172   :  { %731 = vsyncadd [#allocation8], 4294967168 }
 0x173   :  { %474 = vsyncpa [#allocation7], 1 }
 0x174   :  { %475 = vsyncpa [#allocation10], 1 }
 0x175   :  { %476 = vsyncpa [#allocation8], 1 }

</bundles_post_ra>
